<compile_context>
chip_gen: v7x
topology: tpu7x:2x2x1
jax: 0.10.0
libtpu: 0.0.40
codegen_flags: <defaults>
</compile_context>

<pallas_src>
import functools

import jax
import jax.numpy as jnp
from jax.experimental import pallas as pl
from jax.experimental.pallas import tpu as pltpu

EPS = 1e-5


# --------------------------------------------------------------------------- kernels
def _up1x1_kernel(x_ref, w_ref, b_ref, o_ref):
    # x_ref: (1, Cin, T)  bf16  NCHW spatial tile (T spatial positions on lanes)
    # w_ref: (2Co, Cin)   bf16  [w_up*su | w_res*sr] stacked on rows (BN scale folded)
    # b_ref: (2Co, 1)     f32   BN shifts [bu | br]
    # o_ref: (1, 2Co, T)  f32   up half ReLU'd, res half affine only
    pre = jnp.dot(w_ref[...], x_ref[0], preferred_element_type=jnp.float32)  # (2Co, T)
    y = pre + b_ref[...]
    row = jax.lax.broadcasted_iota(jnp.int32, y.shape, 0)
    half = y.shape[0] // 2
    o_ref[...] = jnp.where(row < half, jnp.maximum(y, 0.0), y)[None]


def _concat_conv_kernel(cat_ref, res_ref, w_ref, b_ref, o_ref, *, Wp):
    # cat_ref: (1, 2Co, Hp*Wp) f32  channel-first, zero-padded (1px halo + 1 extra
    #                               bottom row so every flat tap slice stays in bounds)
    # res_ref: (1, Co, Hs*Wp)  f32  residual branch on the same padded-width grid
    # w_ref:   (9, Co, 2Co)    bf16 conv taps with the concat-branch BN scale folded in
    # b_ref:   (Co, 1)         f32  concat-branch BN shift
    # o_ref:   (1, Co, Hs*Wp)  f32  columns j >= Ws are garbage and dropped by the caller
    _, Co, hs_wp = o_ref.shape
    acc = jnp.zeros((Co, hs_wp), jnp.float32)
    k = 0
    for di in range(3):
        for dj in range(3):
            off = di * Wp + dj                                   # static flat lane offset
            win = cat_ref[0, :, off:off + hs_wp].astype(jnp.bfloat16)   # (2Co, Hs*Wp)
            acc = acc + jnp.dot(w_ref[k], win, preferred_element_type=jnp.float32)
            k += 1
    y = jnp.maximum(acc + b_ref[...], 0.0) + res_ref[0]
    o_ref[...] = y[None].astype(o_ref.dtype)


# ----------------------------------------------------------------------------- glue
def _bn_fold(gamma, beta, mean, var):
    scale = gamma / jnp.sqrt(var + EPS)
    return scale, beta - mean * scale


def _pick_tile(m):
    for cand in (2048, 1024, 512, 256, 128):
        if m % cand == 0:
            return cand
    return m


def init_params(key, n_input, n_output, stride):
    ks = jax.random.split(key, 16)

    def rnd(k, shape, s=0.2):
        return jax.random.normal(k, shape, jnp.float32) * s

    p = dict(stride=stride)
    # ConvTranspose2d(n_input, n_output, 1, stride, output_padding=stride-1, bias=False)
    p["w_up"] = rnd(ks[0], (n_input, n_output))
    p["bn_up"] = (1.0 + rnd(ks[1], (n_output,), 0.1), rnd(ks[2], (n_output,), 0.1),
                  rnd(ks[3], (n_output,), 0.1), 1.0 + jnp.abs(rnd(ks[4], (n_output,), 0.1)))
    # Conv2d(2*n_output, n_output, 3, padding=1, bias=False) in HWIO layout.
    p["w_conv"] = rnd(ks[5], (3, 3, 2 * n_output, n_output))
    p["bn_cat"] = (1.0 + rnd(ks[6], (n_output,), 0.1), rnd(ks[7], (n_output,), 0.1),
                   rnd(ks[8], (n_output,), 0.1), 1.0 + jnp.abs(rnd(ks[9], (n_output,), 0.1)))
    # upsample: ConvTranspose2d(n_input, n_output, 1, stride, output_padding, bias=True)
    p["w_res"] = rnd(ks[10], (n_input, n_output))
    p["b_res"] = rnd(ks[11], (n_output,), 0.1)
    p["bn_res"] = (1.0 + rnd(ks[12], (n_output,), 0.1), rnd(ks[13], (n_output,), 0.1),
                   rnd(ks[14], (n_output,), 0.1), 1.0 + jnp.abs(rnd(ks[15], (n_output,), 0.1)))
    return p


def upblock_forward(x_nchw, skip_nchw, p):
    s = p["stride"]
    N, Cin, H, W = x_nchw.shape
    Co = p["w_up"].shape[1]
    Hs, Ws = H * s, W * s
    HW = H * W

    su, bu = _bn_fold(*p["bn_up"])
    sr, br = _bn_fold(*p["bn_res"])
    br = br + sr * p["b_res"]                 # fold ConvTranspose bias into the BN shift
    sc, bc = _bn_fold(*p["bn_cat"])

    # --- Kernel 1: fused ([w_up*su | w_res*sr] @ x) + BN shift (+ReLU on up half),
    # channel-first, tiled over (N, HW) so HBM<->VMEM is pipelined; bf16 matmul
    # inputs, f32 accumulation; spatial dim on lanes -> dense loads/stores.
    x3 = x_nchw.reshape(N, Cin, HW).astype(jnp.bfloat16)
    w1 = jnp.concatenate([p["w_up"] * su[None, :], p["w_res"] * sr[None, :]],
                         axis=1).T.astype(jnp.bfloat16)                       # (2Co, Cin)
    b1 = jnp.concatenate([bu, br]).reshape(2 * Co, 1).astype(jnp.float32)
    T = _pick_tile(HW)
    pre = pl.pallas_call(
        _up1x1_kernel,
        grid=(N, HW // T),
        in_specs=[pl.BlockSpec((1, Cin, T), lambda n, t: (n, 0, t)),
                  pl.BlockSpec((2 * Co, Cin), lambda n, t: (0, 0)),
                  pl.BlockSpec((2 * Co, 1), lambda n, t: (0, 0))],
        out_specs=pl.BlockSpec((1, 2 * Co, T), lambda n, t: (n, 0, t)),
        out_shape=jax.ShapeDtypeStruct((N, 2 * Co, HW), jnp.float32),
        compiler_params=pltpu.CompilerParams(
            dimension_semantics=("parallel", "parallel")),
    )(x3, w1, b1)

    up_cf = pre[:, :Co].reshape(N, Co, H, W)       # free reshapes, no transposes
    res_cf = pre[:, Co:].reshape(N, Co, H, W)

    # --- Glue (single fused producer per tensor), all channel-first:
    # stride-s lattice placement with the exact BN constants at inserted positions
    # (up: max(bu,0), res: br), the 1px zero halo for the 3x3 conv plus one extra
    # bottom zero row (keeps every flat tap slice in bounds), and the skip channels
    # taken straight from NCHW.
    Hp, Wp = Hs + 3, Ws + 2
    up_const = jnp.maximum(bu, 0.0)
    cat_cf = (
        jnp.zeros((N, 2 * Co, Hp, Wp), jnp.float32)
        .at[:, :Co, 1:Hs + 1, 1:Ws + 1].set(
            jnp.broadcast_to(up_const[None, :, None, None], (N, Co, Hs, Ws)))
        .at[:, :Co, 1:Hs + 1:s, 1:Ws + 1:s].set(up_cf)
        .at[:, Co:, 1:Hs + 1, 1:Ws + 1].set(skip_nchw.astype(jnp.float32))
    )
    cat_flat = cat_cf.reshape(N, 2 * Co, Hp * Wp)
    res_flat = (
        jnp.broadcast_to(br[None, :, None, None], (N, Co, Hs, Wp))
        .at[:, :, ::s, :Ws:s].set(res_cf)
    ).reshape(N, Co, Hs * Wp)

    # --- Kernel 2: fused 3x3 conv (9 accumulated MXU matmuls over the flat padded
    # width) + BN + ReLU + residual add; channel-first, lane-dense output.
    w2 = jnp.transpose((p["w_conv"] * sc[None, None, None, :]).reshape(9, 2 * Co, Co),
                       (0, 2, 1)).astype(jnp.bfloat16)                        # (9, Co, 2Co)
    b2 = bc.reshape(Co, 1).astype(jnp.float32)
    out = pl.pallas_call(
        functools.partial(_concat_conv_kernel, Wp=Wp),
        grid=(N,),
        in_specs=[pl.BlockSpec((1, 2 * Co, Hp * Wp), lambda n: (n, 0, 0)),
                  pl.BlockSpec((1, Co, Hs * Wp), lambda n: (n, 0, 0)),
                  pl.BlockSpec((9, Co, 2 * Co), lambda n: (0, 0, 0)),
                  pl.BlockSpec((Co, 1), lambda n: (0, 0))],
        out_specs=pl.BlockSpec((1, Co, Hs * Wp), lambda n: (n, 0, 0)),
        out_shape=jax.ShapeDtypeStruct((N, Co, Hs * Wp), jnp.float32),
        compiler_params=pltpu.CompilerParams(dimension_semantics=("parallel",)),
    )(cat_flat, res_flat, w2, b2)

    # Drop the 2 padded columns; everything else is already NCHW.
    return out.reshape(N, Co, Hs, Wp)[:, :, :, :Ws]


# Pure-JAX reference (identical math, no Pallas, f32) used to validate the kernels.
def upblock_reference(x_nchw, skip_nchw, p):
    s = p["stride"]
    x = jnp.transpose(x_nchw, (0, 2, 3, 1)).astype(jnp.float32)
    skip = jnp.transpose(skip_nchw, (0, 2, 3, 1)).astype(jnp.float32)
    N, H, W, Cin = x.shape
    Co = p["w_up"].shape[1]
    Hs, Ws = H * s, W * s
    su, bu = _bn_fold(*p["bn_up"])
    sr, br = _bn_fold(*p["bn_res"])
    br = br + sr * p["b_res"]
    sc, bc = _bn_fold(*p["bn_cat"])
    hp = jax.lax.Precision.HIGHEST
    up_pre = jnp.einsum("nhwi,io->nhwo", x, p["w_up"], precision=hp)
    res_pre = jnp.einsum("nhwi,io->nhwo", x, p["w_res"], precision=hp)
    up_full = jnp.zeros((N, Hs, Ws, Co)).at[:, ::s, ::s, :].set(up_pre)
    res_full = jnp.zeros((N, Hs, Ws, Co)).at[:, ::s, ::s, :].set(res_pre)
    up_x = jnp.maximum(up_full * su + bu, 0.0)
    res = res_full * sr + br
    cat = jnp.concatenate([up_x, skip], axis=-1)
    catp = jnp.pad(cat, ((0, 0), (1, 1), (1, 1), (0, 0)))
    conv = jnp.zeros((N, Hs, Ws, Co))
    for di in range(3):
        for dj in range(3):
            conv = conv + jnp.einsum("nhwi,io->nhwo",
                                     catp[:, di:di + Hs, dj:dj + Ws, :],
                                     p["w_conv"][di, dj], precision=hp)
    return jnp.transpose(jnp.maximum(conv * sc + bc, 0.0) + res, (0, 3, 1, 2))


if __name__ == "__main__":
    key = jax.random.PRNGKey(0)
    k_p, k_x, k_s = jax.random.split(key, 3)
    N, Cin, Co, H, W, stride = 2, 4, 8, 16, 16, 2

    params = init_params(k_p, Cin, Co, stride)
    x = jax.random.normal(k_x, (N, Cin, H, W), jnp.float32)                    # NCHW
    skip_x = jax.random.normal(k_s, (N, Co, H * stride, W * stride), jnp.float32)

    out = jax.block_until_ready(upblock_forward(x, skip_x, params))
    assert out.shape == (N, Co, H * stride, W * stride)

    ref = jax.block_until_ready(upblock_reference(x, skip_x, params))
    err = float(jnp.max(jnp.abs(out - ref)))
    tol = 3e-2 * float(jnp.max(jnp.abs(ref))) + 1e-3   # bf16 MXU inputs -> relaxed tol
    assert err < tol, f"max abs err {err} (tol {tol})"

    print("KERNEL_OK")
</pallas_src>

<mosaic_0001>
module attributes {stable_mosaic.version = 11 : i64} {
  func.func @_up1x1_kernel(%arg0: i32, %arg1: i32, %arg2: memref<1x4x256xbf16, #tpu.memory_space<vmem>>, %arg3: memref<16x4xbf16, #tpu.memory_space<vmem>>, %arg4: memref<16x1xf32, #tpu.memory_space<vmem>>, %arg5: memref<1x16x256xf32, #tpu.memory_space<vmem>>) attributes {dimension_semantics = [#tpu.dimension_semantics<parallel>, #tpu.dimension_semantics<parallel>], iteration_bounds = array<i64: 2, 1>, scalar_prefetch = 0 : i64, scratch_operands = 0 : i64, tpu.core_type = #tpu.core_type<tc>, window_params = [{transform_indices = @transform_0, window_bounds = array<i64: 1, 4, 256>}, {pipeline_mode = #tpu.pipeline_mode<synchronous>, transform_indices = @transform_1, window_bounds = array<i64: 16, 4>}, {pipeline_mode = #tpu.pipeline_mode<synchronous>, transform_indices = @transform_2, window_bounds = array<i64: 16, 1>}, {transform_indices = @transform_3, window_bounds = array<i64: 1, 16, 256>}]} {
    %c0 = arith.constant 0 : index
    %c0_0 = arith.constant 0 : index
    %0 = vector.load %arg3[%c0, %c0_0] : memref<16x4xbf16, #tpu.memory_space<vmem>>, vector<16x4xbf16>
    %c0_1 = arith.constant 0 : index
    %c0_2 = arith.constant 0 : index
    %c0_3 = arith.constant 0 : index
    %1 = vector.load %arg2[%c0_1, %c0_2, %c0_3] : memref<1x4x256xbf16, #tpu.memory_space<vmem>>, vector<1x4x256xbf16>
    %2 = vector.shape_cast %1 : vector<1x4x256xbf16> to vector<4x256xbf16>
    %cst = arith.constant dense<0.000000e+00> : vector<16x256xf32>
    %3 = tpu.matmul %0, %2, %cst {dimension_numbers = #tpu.dot_dimension_numbers<[1], [0], [0], [1], [0, 0, 1, 1], [], []>} : vector<16x4xbf16>, vector<4x256xbf16>, vector<16x256xf32> -> vector<16x256xf32>
    %c0_4 = arith.constant 0 : index
    %c0_5 = arith.constant 0 : index
    %4 = vector.load %arg4[%c0_4, %c0_5] : memref<16x1xf32, #tpu.memory_space<vmem>>, vector<16x1xf32>
    %5 = vector.broadcast %4 : vector<16x1xf32> to vector<16x256xf32>
    %6 = arith.addf %3, %5 : vector<16x256xf32>
    %7 = tpu.iota {dimensions = array<i32: 0>} : vector<16x256xi32>
    %c8_i32 = arith.constant 8 : i32
    %8 = vector.broadcast %c8_i32 : i32 to vector<16x256xi32>
    %9 = arith.cmpi slt, %7, %8 : vector<16x256xi32>
    %cst_6 = arith.constant 0.000000e+00 : f32
    %10 = vector.broadcast %cst_6 : f32 to vector<16x256xf32>
    %11 = arith.maximumf %6, %10 : vector<16x256xf32>
    %12 = arith.select %9, %11, %6 : vector<16x256xi1>, vector<16x256xf32>
    %13 = vector.shape_cast %12 : vector<16x256xf32> to vector<1x16x256xf32>
    %c0_7 = arith.constant 0 : index
    %c0_8 = arith.constant 0 : index
    %c0_9 = arith.constant 0 : index
    %14 = vector.load %arg5[%c0_7, %c0_8, %c0_9] : memref<1x16x256xf32, #tpu.memory_space<vmem>>, vector<1x16x256xf32>
    tpu.vector_store %arg5[%c0_7, %c0_8, %c0_9], %13 {strides = array<i32>} : memref<1x16x256xf32, #tpu.memory_space<vmem>>, vector<1x16x256xf32>,
    return
  }
  func.func @transform_0(%arg0: i32, %arg1: i32) -> (i32, i32, i32) {
    %c0_i32 = arith.constant 0 : i32
    %c0_i32_0 = arith.constant 0 : i32
    return %arg0, %c0_i32, %arg1 : i32, i32, i32
  }
  func.func @transform_1(%arg0: i32, %arg1: i32) -> (i32, i32) {
    %c0_i32 = arith.constant 0 : i32
    %c0_i32_0 = arith.constant 0 : i32
    %c0_i32_1 = arith.constant 0 : i32
    return %c0_i32, %c0_i32_0 : i32, i32
  }
  func.func @transform_2(%arg0: i32, %arg1: i32) -> (i32, i32) {
    %c0_i32 = arith.constant 0 : i32
    %c0_i32_0 = arith.constant 0 : i32
    %c0_i32_1 = arith.constant 0 : i32
    return %c0_i32, %c0_i32_0 : i32, i32
  }
  func.func @transform_3(%arg0: i32, %arg1: i32) -> (i32, i32, i32) {
    %c0_i32 = arith.constant 0 : i32
    %c0_i32_0 = arith.constant 0 : i32
    return %arg0, %c0_i32, %arg1 : i32, i32, i32
  }
}

</mosaic_0001>

<bundles_post_ra>
// kernel: tpu_custom_call.1
= control target key start
LH: loop header
LB: loop body
LE: loop exit
PB: predicated region body
PF: predicated region fallthrough
CT: control target
= control target key end

     0   :  { %8 = vsyncpa [#allocation3], 0  ;;  %s703_s0 = inlined_call_operand.vmem [shape: bf16[2,4,256], index: 0, kind: input, shape index: {}]   ;;  %s704_s1 = inlined_call_operand.vmem [shape: bf16[16,4], index: 1, kind: input, shape index: {}]   ;;  %s705_s2 = inlined_call_operand.vmem [shape: f32[16,1], index: 2, kind: input, shape index: {}]   ;;  %s706_s3 = inlined_call_operand.hbm [shape: f32[2,16,256], index: 3, kind: output, shape index: {}]  }
   0x1   :  { %10 = vsyncpa [#allocation3 + $0x1], 0  ;;  %s579_s12 = smov 0   ;;  %s581_s13 = smov 0  }
   0x2   :  { %s583_s14 = smov 0   ;;  %s585_s15 = smov 0  }
   0x3   :  { %s587_s16 = smov 0   ;;  %s589_s17 = smov 0  }
   0x4 LB: > { %s396_s18 = sadd.s32 4294967295, %s553_s17   ;;  %s397_s19 = sadd.s32 4294967294, %s553_s17   ;;  %s553_s17 = sphi %s589_s17, %s16_s17   ;;  %s549_s16 = sphi %s587_s16, %s713_s16   ;;  %s545_s15 = sphi %s585_s15, %s712_s15   ;;  %s541_s14 = sphi %s583_s14, %s711_s14   ;;  %s537_s13 = sphi %s581_s13, %s710_s13   ;;  %s533_s12 = sphi %s579_s12, %s709_s12  }
   0x5   : > { %s28_s20 = sadd.s32 1, %s549_s16  ;;  %s107_s21 = sadd.s32 1, %s541_s14 }
   0x6   : > { %p30_p0 = scmp.ge.s32.totalorder %s28_s20, 2  ;;  %p117_p1 = scmp.ne.s32.totalorder %s541_s14, %s537_s13 }
   0x7   : > { %p118_p2 = scmp.eq.s32.totalorder %s396_s18, 1  ;;  %p123_p3 = scmp.ne.s32.totalorder %s537_s13, %s533_s12 }
   0x8   : > { %s715_s20 = smov (%p30_p0, %s28_s20), 0  ;;  %p124_p5 = scmp.eq.s32.totalorder %s397_s19, 1 }
   0x9   : > { %p619_p4 = por %p118_p2, %p117_p1  ;;  %s102_s23 = ssub.s32 %s549_s16, %s715_s20 }
   0xa   : > { %p400_p6 = scmp.ge.s32.totalorder %s553_s17, 1  ;;  %p105_p7 = scmp.eq.s32.totalorder %s102_s23, 0 }
   0xb   : > { %p626_p8 = por %p124_p5, %p123_p3  ;;  %p161_p9 = scmp.lt.s32.totalorder %s553_s17, 3 }
   0xc   : > { %s632_s25 = scalar_select %p105_p7, %s541_s14, %s107_s21  }
   0xd   : > { %p162_p10 = pnand %p400_p6, %p161_p9 }
   0xe   : > { %p190_p11 = scmp.lt.s32.totalorder (!%p162_p10), %s545_s15, 1  ;;  %v555_v0 = vmov (!%p162_p10), 0   ;;  %v204_v1 = vld [vmem:[%s705_s2] sm:$0xff] (!%p162_p10)  ;;  %v205_v2 = vld [vmem:[%s705_s2 + $0x8] sm:$0xff] (!%p162_p10)  ;;  %vm234_vm0 = vcmask (!%p162_p10), 1041408   ;;  %vm230_vm1 = vcmask (!%p162_p10), 31744  }
   0xf   : > { %165 = sbr.rel (%p162_p10) target bundleno = 265 (0x109), region = 32  ;;  %273 = vmatprep.mubr.bf16.mxu0 (!%p162_p10), %v555_v0  ;;  %473 = vset.pattern.permute.xlu0 (!%p162_p10), %v555_v0  ;;  %v474_v6 = vld [vmem:[%s704_s1] sm:$0xff] (!%p162_p10)   ;;  %s186_s10 = sand.u32 (!%p162_p10), 1, %s537_s13  }
  0x10   : > { %208 = vperm.xlu0 (!%p162_p10), %473, %v204_v1   ;;  %s401_s11 = sshll.u32 (!%p162_p10), %s186_s10, 5  ;;  %s414_s21 = sshll.u32 (!%p162_p10), %s545_s15, 9 }
  0x11   : > { %s188_s18 = scalar_lea.vmem (!%p162_p10), [#allocation2], %s401_s11  ;;  %s655_s27 = scalar_lea.hbm (!%p162_p10), %s706_s3, %s414_s21 }
  0x12   : > { %s317_s19 = sshll.u32 (!%p162_p10), %s188_s18, 4  ;;  %s556_s29 = smov (!%p162_p10), [#allocation2]   ;;  %s650_s19 = int_to_ptr.vmem [resolvable:$true] %s317_s19 }
  0x13   : > { %s479_s30 = sshll.u32 (!%p162_p10), %s556_s29, 4  ;;  %s480_s30 = int_to_ptr.vmem [resolvable:$false] %s479_s30 }
  0x14   : > { %213 = vperm.xlu0 (!%p162_p10), %473, %v205_v2   ;;  %p482_p1 = scmp.lt.s32.totalorder (!%p162_p10), %s650_s19, %s480_s30 }
  0x16   : > { %s191_s28 = scalar_select %p190_p11, %s545_s15, 1 }
  0x17   : > { %s657_s15 = scalar_lea.sflag [#allocation3], %s186_s10 }
  0x18   : > { %s413_s4 = sshll.u32 %s191_s28, 2  ;;  %s475_s28 = scalar_lea.vmem %s650_s19, 512 }
  0x19   : > { %s197_s7 = scalar_lea.vmem %s703_s0, %s413_s4  ;;  %p476_p12 = scmp.ne.s32.totalorder %s650_s19, %s475_s28 }
  0x1a   : > { %v405_v3 = vld.sshfl [vmem:[%s197_s7] sm:$0x33 pattern:$0x76325410]  ;;  %s481_s4 = scalar_lea.vmem %s480_s30, 1024 }
  0x1b   : > { %v229_v4 = vcombine.high %v405_v3, %v405_v3  ;;  %v236_v5 = vsel %vm234_vm0, %v405_v3, 0  ;;  %p477_p13 = pnand %p476_p12, %p619_p4  ;;  %p483_p2 = scmp.lt.s32.totalorder %s481_s4, %s475_s28 }
  0x1d   : > { %406 = vmatprep.subr.msk.bf16.mxu0 %vm234_vm0, %v229_v4  ;;  %p478_p0 = pneg %p477_p13  ;;  %p484_p3 = por %p483_p2, %p482_p1 }
  0x1e   : > { %242 = vmatpush1.bf16.msra.mxu0 %v236_v5 }
  0x1f   : > { %p485_p5 = pnand %p484_p3, %p478_p0 }
  0x21   : > { %407 = vmatmul.mubr.msk.bf16.vlgmr.msra.gmra.mrb[0].mxu0 %vm230_vm1, %v474_v6 }
  0x8f   : > { %v209_v7 = vpop.permute.xlu0 %208 }
  0x93   : > { %v214_v11 = vpop.permute.xlu0 %213 }
  0xf4   : > { %v275_v8 = vpop.f32.mrb[0].mxu0 }
  0xf5   : > { %v276_v9 = vadd.f32 %v275_v8, %v209_v7  ;;  %v277_v10 = vpop.f32.mrb[1].mxu0 }
  0xf6   : > { %v278_v12 = vadd.f32 %v277_v10, %v209_v7  ;;  %v279_v13 = vpop.f32.mrb[2].mxu0 }
  0xf7   : > { %v289_v14 = vmax.f32 %v276_v9, 0.0  ;;  %v280_v15 = vadd.f32 %v279_v13, %v214_v11  ;;  %v281_v16 = vpop.f32.mrb[3].mxu0 }
  0xf8   : > { %v290_v17 = vmax.f32 %v278_v12, 0.0  ;;  %v282_v18 = vadd.f32 %v281_v16, %v214_v11 }
  0xf9   : > { %297 = vst [vmem:[%s188_s18] sm:$0xff] %v289_v14  ;;  %299 = vst [vmem:[%s188_s18 + $0x10] sm:$0xff] %v280_v15 }
  0xfa   : > { %298 = vst [vmem:[%s188_s18 + $0x8] sm:$0xff] %v290_v17  ;;  %300 = vst [vmem:[%s188_s18 + $0x18] sm:$0xff] %v282_v18 }
  0xfb   : > { %488 = shalt.err (!%p485_p5)
}
  0xfc   : > { %s489_s5 = scalar_lea.hbm %s655_s27, 512  ;;  %s493_s8 = scalar_lea.hbm %s706_s3, 1024 }
  0xfd   : > { %p490_p6 = scmp.ne.s32.totalorder %s655_s27, %s489_s5  ;;  %p494_p10 = scmp.lt.u32.totalorder %s655_s27, %s706_s3 }
  0xfe   : > { %p495_p11 = scmp.lt.u32.totalorder %s493_s8, %s489_s5  ;;  %p497_p13 = scmp.lt.u32.totalorder %s489_s5, %s655_s27 }
  0xff   : > { %p491_p7 = pnand %p490_p6, %p619_p4 }
 0x100   : > { %p496_p12 = por %p495_p11, %p494_p10 }
 0x101   : > { %p492_p9 = pneg %p491_p7 }
 0x102   : > { %p498_p0 = por %p497_p13, %p496_p12 }
 0x104   : > { %p499_p1 = pnand %p498_p0, %p492_p9 }
 0x106   : > { %502 = shalt.err (!%p499_p1)
}
 0x107   : > { %s557_s11 = smov 256   ;;  %s558_s18 = smov 16  }
 0x108   : > { %415 = dma.vmem_to_hbm [thread:$0]  (%p619_p4), %s650_s19, 512, %s655_s27, %s657_s15, %s557_s11, %s557_s11, %s558_s18  }
 0x109 PF: > { %p421_p2 = scmp.ge.s32.totalorder %s553_s17, 2  ;;  %s332_s21 = sand.u32 1, %s533_s12  }
 0x10a   : > { %s333_s23 = scalar_lea.sflag [#allocation3], %s332_s21 }
 0x10b   : > { %p418_p3 = pnand %p421_p2, %p626_p8 }
 0x10d   : > { %528 = dma.done.wait (!%p418_p3), %s333_s23, 512  }
 0x10e   : > { %530 = vsyncadd (!%p418_p3), %s333_s23, 4294966784  ;;  %s16_s17 = sadd.s32 1, %s553_s17   ;;  %s709_s12 = smov %s537_s13 }
 0x10f   : > { %p13_p5 = scmp.ge.s32.totalorder %s16_s17, 4   ;;  %s710_s13 = smov %s541_s14 }
 0x110   : > { %s711_s14 = smov %s632_s25  ;;  %s712_s15 = smov %s549_s16 }
 0x111   : > { %s713_s16 = smov %s715_s20  ;;  %15 = sbr.rel (!%p13_p5) target bundleno = 4 (0x4), region = 67 }
 0x118   :  { %338 = vsyncpa [#allocation3], 1 }
 0x119   :  { %340 = vsyncpa [#allocation3 + $0x1], 1 }

</bundles_post_ra>
